<compile_context>
chip_gen: v5e
topology: v5e:2x2
jax: 0.10.0
libtpu: 0.0.40
codegen_flags: <defaults>
</compile_context>

<pallas_src>
import functools

import jax
import jax.numpy as jnp
from jax.experimental import pallas as pl
from jax.experimental.pallas import tpu as pltpu

_LANES = 128
# Per-block f32 compute slab (elementwise temporaries are f32); the input block
# is <= this (equal for f32 inputs, half for bf16).  4096 rows x 128 x 4B = 2 MiB.
_TARGET_F32_BLOCK_BYTES = 2 * 1024 * 1024


def _round_up(x, m):
    return (x + m - 1) // m * m


def _cdiv(a, b):
    return -(-a // b)


def _device_kind():
    try:
        return jax.devices()[0].device_kind.lower()
    except Exception:  # pragma: no cover - defensive
        return ""


def _is_v7x(kind):
    # v7x has 2 TensorCores per chip; v5e/v6e have 1.
    return ("v7" in kind) or ("tpu7" in kind)


def _has_bf16_eup(kind):
    # v5 and older have no bf16 VPU/EUP; keep f32 transcendentals there.
    if not kind:
        return False
    for tag in ("v2", "v3", "v4", "v5"):
        if tag in kind:
            return False
    return True


def _bce_partial_kernel(pred_ref, out_ref, *, label_is_one, logits, row_tile,
                        bf16_tail):
    """Accumulates per-lane partial BCE sums into a (1, 8, 128) output block.

    No padding mask: the wrapper pads with a loss-neutral value, so pad
    elements contribute exactly zero to the sum.
    """
    j = pl.program_id(1)   # reduction step ("arbitrary")

    @pl.when(j == 0)
    def _():
        out_ref[...] = jnp.zeros_like(out_ref)

    p = pred_ref[...]

    # Label is a trace-time constant -> specialize away half the work.
    if logits:
        # BCEWithLogitsLoss, numerically stable:
        #   y=1: softplus(-x) = max(-x,0) + log1p(exp(-|x|))
        #   y=0: softplus( x) = max( x,0) + log1p(exp(-|x|))
        if bf16_tail and p.dtype == jnp.bfloat16:
            # bf16 EUP path (v6e/v7x): keep exp/log1p in bf16, accumulate in f32.
            tail = jnp.log1p(jnp.exp(-jnp.abs(p))).astype(jnp.float32)
        else:
            xf = p.astype(jnp.float32)
            tail = jnp.log1p(jnp.exp(-jnp.abs(xf)))
        x = p.astype(jnp.float32)
        if label_is_one:
            elem = jnp.maximum(-x, 0.0) + tail
        else:
            elem = jnp.maximum(x, 0.0) + tail
    else:
        # BCELoss with PyTorch's clamp of the log terms at -100.
        x = p.astype(jnp.float32)
        if label_is_one:
            elem = -jnp.maximum(jnp.log(x), -100.0)
        else:
            elem = -jnp.maximum(jnp.log(1.0 - x), -100.0)

    # VPU-only partial reduce down to one (8, 128) vreg per core split; the
    # final cross-lane reduce happens once in the wrapper.
    out_ref[...] += jnp.sum(
        elem.reshape(row_tile // 8, 8, _LANES), axis=0, keepdims=True)


def adversarial_loss(predictions, is_real, *, logits=False):
    """Equivalent of AdversarialLoss(logits).forward(predictions, is_real).

    predictions: any-shaped float array (probabilities if logits=False, raw
                 logits if logits=True), any float dtype (kept native in HBM).
    is_real:     Python bool (labels all-ones if True, all-zeros if False);
                 baked in at trace time.
    Returns a scalar float32 mean loss.
    """
    is_real = bool(is_real)
    logits = bool(logits)

    flat = predictions.reshape(-1)
    n = flat.shape[0]

    itemsize = jnp.dtype(flat.dtype).itemsize
    min_rows = 8 * max(1, 4 // itemsize)   # (8,128) f32, (16,128) bf16, (32,128) 8-bit

    kind = _device_kind()
    use_bf16_tail = logits and flat.dtype == jnp.bfloat16 and _has_bf16_eup(kind)

    # Tile sizing: cap by the f32 compute-slab bytes (elementwise temporaries are
    # f32), so VMEM stays bounded for every input dtype while the input block is
    # still >= 1 MiB (85%+ of the measured HBM roofline plateau).
    max_row_tile = max(min_rows,
                       (_TARGET_F32_BLOCK_BYTES // (_LANES * 4)) // min_rows * min_rows)

    rows_needed = max(1, _cdiv(n, _LANES))

    # Core split: only pays off on v7x (2 TensorCores); on single-TC chips it is
    # a size-1 grid axis (no extra steps, no shrunken tiles, no extra writeback).
    # TODO(synk): confirm on v7x (xprof) that the "parallel" leading axis really
    # shards across both TensorCores; if not, switch it to pltpu.CORE_PARALLEL
    # (or restructure with pl.core_map over create_tensorcore_mesh).
    num_split = 2 if (_is_v7x(kind) and rows_needed >= 2 * min_rows) else 1

    per_split = _cdiv(rows_needed, num_split)
    row_tile = max(min_rows, min(max_row_tile, _round_up(per_split, min_rows)))
    steps = max(1, _cdiv(rows_needed, num_split * row_tile))
    rows = num_split * steps * row_tile
    padded_n = rows * _LANES

    # Loss-neutral pad value (no in-kernel mask, no analytic correction needed):
    #   BCE     y=1: -log(1)      = 0      -> pad 1.0
    #   BCE     y=0: -log(1-0)    = 0      -> pad 0.0
    #   logits  y=1: softplus(-1e4) == 0   -> pad +1e4  (exp underflows to 0)
    #   logits  y=0: softplus(+(-1e4)) == 0 -> pad -1e4
    if logits:
        pad_val = 1e4 if is_real else -1e4
    else:
        pad_val = 1.0 if is_real else 0.0

    # Single pad pass in the native dtype.
    flat_padded = jnp.pad(flat, (0, padded_n - n), constant_values=pad_val)
    pred2d = flat_padded.reshape(rows, _LANES)

    kernel = functools.partial(
        _bce_partial_kernel,
        label_is_one=is_real, logits=logits, row_tile=row_tile,
        bf16_tail=use_bf16_tail)

    cost = pl.CostEstimate(
        flops=4 * padded_n,
        transcendentals=(2 if logits else 1) * padded_n,
        bytes_accessed=padded_n * itemsize + num_split * 8 * _LANES * 4,
    )

    partials = pl.pallas_call(
        kernel,
        out_shape=jax.ShapeDtypeStruct((num_split, 8, _LANES), jnp.float32),
        grid_spec=pltpu.PrefetchScalarGridSpec(
            num_scalar_prefetch=0,
            grid=(num_split, steps),
            in_specs=[
                pl.BlockSpec((row_tile, _LANES),
                             lambda i, j: (i * steps + j, 0)),
            ],
            out_specs=pl.BlockSpec((1, 8, _LANES), lambda i, j: (i, 0, 0)),
        ),
        compiler_params=pltpu.CompilerParams(
            dimension_semantics=("parallel", "arbitrary"),
            vmem_limit_bytes=32 * 1024 * 1024),
        cost_estimate=cost,
    )(pred2d)

    return jnp.sum(partials) / jnp.float32(n)


def _reference_loss(predictions, is_real, *, logits=False):
    x = predictions.astype(jnp.float32)
    y = jnp.float32(1.0 if is_real else 0.0)
    if logits:
        elem = jnp.maximum(x, 0.0) - x * y + jnp.log1p(jnp.exp(-jnp.abs(x)))
    else:
        elem = -(y * jnp.maximum(jnp.log(x), -100.0)
                 + (1.0 - y) * jnp.maximum(jnp.log(1.0 - x), -100.0))
    return jnp.mean(elem)


if __name__ == "__main__":
    key = jax.random.PRNGKey(0)
    k1, k2, k3 = jax.random.split(key, 3)

    # Discriminator-style output: (batch=2, channels=4, H=16, W=16), NCHW-like.
    raw = jax.random.normal(k1, (2, 4, 16, 16), dtype=jnp.float32)
    probs = jax.nn.sigmoid(raw)                              # valid probabilities for BCELoss
    logits_in = jax.random.normal(k2, (2, 4, 16, 16), dtype=jnp.float32)
    ragged = jax.nn.sigmoid(                                 # non-multiple-of-128 size
        jax.random.normal(k3, (2, 3, 7, 5), dtype=jnp.float32))

    ok = True
    for is_real in (True, False):
        out = jax.block_until_ready(adversarial_loss(probs, is_real, logits=False))
        ref = _reference_loss(probs, is_real, logits=False)
        ok &= bool(jnp.allclose(out, ref, rtol=1e-5, atol=1e-5))

        out_l = jax.block_until_ready(
            adversarial_loss(logits_in, is_real, logits=True))
        ref_l = _reference_loss(logits_in, is_real, logits=True)
        ok &= bool(jnp.allclose(out_l, ref_l, rtol=1e-5, atol=1e-5))

        out_r = jax.block_until_ready(
            adversarial_loss(ragged, is_real, logits=False))
        ref_r = _reference_loss(ragged, is_real, logits=False)
        ok &= bool(jnp.allclose(out_r, ref_r, rtol=1e-5, atol=1e-5))

        out_b = jax.block_until_ready(
            adversarial_loss(logits_in.astype(jnp.bfloat16), is_real, logits=True))
        ref_b = _reference_loss(logits_in.astype(jnp.bfloat16), is_real, logits=True)
        ok &= bool(jnp.allclose(out_b, ref_b, rtol=1e-3, atol=1e-3))

    if ok:
        print("KERNEL_OK")
    else:
        print("MISMATCH")
</pallas_src>

<mosaic_0001>
module attributes {stable_mosaic.version = 11 : i64} {
  func.func @_bce_partial_kernel(%arg0: i32, %arg1: i32, %arg2: memref<16x128xf32, #tpu.memory_space<vmem>>, %arg3: memref<1x8x128xf32, #tpu.memory_space<vmem>>) attributes {dimension_semantics = [#tpu.dimension_semantics<parallel>, #tpu.dimension_semantics<arbitrary>], iteration_bounds = array<i64: 1, 1>, scalar_prefetch = 0 : i64, scratch_operands = 0 : i64, tpu.core_type = #tpu.core_type<tc>, window_params = [{transform_indices = @transform_0, window_bounds = array<i64: 16, 128>}, {transform_indices = @transform_1, window_bounds = array<i64: 1, 8, 128>}]} {
    %c0_i32 = arith.constant 0 : i32
    %0 = arith.cmpi eq, %arg1, %c0_i32 : i32
    %1 = arith.extui %0 : i1 to i32
    %c0_i32_0 = arith.constant 0 : i32
    %2 = arith.cmpi ne, %1, %c0_i32_0 : i32
    scf.if %2 {
      %cst_10 = arith.constant 0.000000e+00 : f32
      %15 = vector.broadcast %cst_10 : f32 to vector<1x8x128xf32>
      %c0_11 = arith.constant 0 : index
      %c0_12 = arith.constant 0 : index
      %c0_13 = arith.constant 0 : index
      %16 = vector.load %arg3[%c0_11, %c0_12, %c0_13] : memref<1x8x128xf32, #tpu.memory_space<vmem>>, vector<1x8x128xf32>
      tpu.vector_store %arg3[%c0_11, %c0_12, %c0_13], %15 {strides = array<i32>} : memref<1x8x128xf32, #tpu.memory_space<vmem>>, vector<1x8x128xf32>,
    } else {
    }
    %c0 = arith.constant 0 : index
    %c0_1 = arith.constant 0 : index
    %3 = vector.load %arg2[%c0, %c0_1] : memref<16x128xf32, #tpu.memory_space<vmem>>, vector<16x128xf32>
    %4 = math.log %3 : vector<16x128xf32>
    %cst = arith.constant -1.000000e+02 : f32
    %5 = vector.broadcast %cst : f32 to vector<16x128xf32>
    %6 = arith.maximumf %4, %5 : vector<16x128xf32>
    %cst_2 = arith.constant 0.000000e+00 : f32
    %7 = vector.broadcast %cst_2 : f32 to vector<16x128xf32>
    %8 = arith.subf %7, %6 : vector<16x128xf32>
    %c0_3 = arith.constant 0 : index
    %c0_4 = arith.constant 0 : index
    %c0_5 = arith.constant 0 : index
    %9 = vector.load %arg3[%c0_3, %c0_4, %c0_5] : memref<1x8x128xf32, #tpu.memory_space<vmem>>, vector<1x8x128xf32>
    %10 = vector.shape_cast %8 : vector<16x128xf32> to vector<2x8x128xf32>
    %cst_6 = arith.constant dense<0.000000e+00> : vector<8x128xf32>
    %11 = vector.multi_reduction <add>, %10, %cst_6 [0] : vector<2x8x128xf32> to vector<8x128xf32>
    %12 = vector.shape_cast %11 : vector<8x128xf32> to vector<1x8x128xf32>
    %13 = arith.addf %9, %12 : vector<1x8x128xf32>
    %c0_7 = arith.constant 0 : index
    %c0_8 = arith.constant 0 : index
    %c0_9 = arith.constant 0 : index
    %14 = vector.load %arg3[%c0_7, %c0_8, %c0_9] : memref<1x8x128xf32, #tpu.memory_space<vmem>>, vector<1x8x128xf32>
    tpu.vector_store %arg3[%c0_7, %c0_8, %c0_9], %13 {strides = array<i32>} : memref<1x8x128xf32, #tpu.memory_space<vmem>>, vector<1x8x128xf32>,
    return
  }
  func.func @transform_0(%arg0: i32, %arg1: i32) -> (i32, i32) {
    %c1_i32 = arith.constant 1 : i32
    %0 = arith.muli %arg0, %c1_i32 : i32
    %1 = arith.addi %0, %arg1 : i32
    %c0_i32 = arith.constant 0 : i32
    %c0_i32_0 = arith.constant 0 : i32
    return %1, %c0_i32 : i32, i32
  }
  func.func @transform_1(%arg0: i32, %arg1: i32) -> (i32, i32, i32) {
    %c0_i32 = arith.constant 0 : i32
    %c0_i32_0 = arith.constant 0 : i32
    %c0_i32_1 = arith.constant 0 : i32
    return %arg0, %c0_i32, %c0_i32_0 : i32, i32, i32
  }
}

</mosaic_0001>

<bundles_post_ra>
// kernel: tpu_custom_call.1
= control target key start
LH: loop header
LB: loop body
LE: loop exit
PB: predicated region body
PF: predicated region fallthrough
CT: control target
= control target key end

     0   :  { %6 = vsyncpa [#allocation3], 0  ;;  %s148_s0 = inlined_call_operand.hbm [shape: f32[16,128], index: 0, kind: input, shape index: {}]   ;;  %s149_s1 = inlined_call_operand.hbm [shape: f32[1,8,128], index: 1, kind: output, shape index: {}]  }
   0x1   :  { %7 = vsyncpa [#allocation4], 0  ;;  %s16_s8 = sshll.u32 %s148_s0, 4  ;;  %s128_s9 = smov [#allocation2]   ;;  %s17_s8 = int_to_ptr.hbm [resolvable:$true] %s16_s8 }
   0x2   :  { %s18_s10 = sshll.u32 %s128_s9, 4  ;;  %s129_s11 = smov 128   ;;  %s19_s10 = int_to_ptr.vmem [resolvable:$true] %s18_s10 }
   0x3   :  { %s130_s12 = smov 8  }
   0x4   :  { %24 = dma.hbm_to_vmem [thread:$0]  %s17_s8, 256, %s19_s10, [#allocation3], %s129_s11, %s129_s11, %s130_s12  }
   0x5   :  { %124 = dma.done.wait [#allocation3], 256  }
   0x6   :  { %125 = vsyncadd [#allocation3], 4294967040  ;;  %v36_v0 = vld [vmem:[#allocation2] sm:$0xff]  ;;  %v37_v1 = vld [vmem:[#allocation2 + $0x8] sm:$0xff]  ;;  %s131_s0 = smov [#allocation5]   ;;  %s57_s16 = sshll.u32 %s149_s1, 4  ;;  %s58_s16 = int_to_ptr.hbm [resolvable:$true] %s57_s16 }
   0x7   :  { %72 = vlog2.f32 %v36_v0  ;;  %s55_s13 = sshll.u32 %s131_s0, 4  ;;  %s56_s13 = int_to_ptr.vmem [resolvable:$true] %s55_s13 }
   0x8   :  { %74 = vlog2.f32 %v37_v1 }
   0xd   :  { %v73_v2 = vpop.eup %72 }
   0xe   :  { %v75_v3 = vpop.eup %74  ;;  %v39_v4 = vmul.f32 0.6931472, %v73_v2 }
   0xf   :  { %v41_v5 = vmul.f32 0.6931472, %v75_v3 }
  0x10   :  { %v42_v6 = vmax.f32 %v39_v4, -100.0 }
  0x11   :  { %v43_v7 = vmax.f32 %v41_v5, -100.0 }
  0x12   :  { %v44_v8 = vsub.f32 0.0, %v42_v6 }
  0x13   :  { %v45_v9 = vsub.f32 0.0, %v43_v7 }
  0x15   :  { %v47_v10 = vadd.f32 %v45_v9, %v44_v8 }
  0x17   :  { %49 = vst [vmem:[#allocation5] sm:$0xff] %v47_v10 }
  0x18   :  { %60 = dma.vmem_to_hbm [thread:$0]  %s56_s13, 128, %s58_s16, [#allocation4]  }
  0x19   :  { %126 = dma.done.wait [#allocation4], 128  }
  0x1a   :  { %127 = vsyncadd [#allocation4], 4294967168 }
  0x1b   :  { %65 = vsyncpa [#allocation3], 1 }
  0x1c   :  { %66 = vsyncpa [#allocation4], 1 }

</bundles_post_ra>
